<compile_context>
chip_gen: v5e
topology: v5e:2x2
jax: 0.10.0
libtpu: 0.0.40
codegen_flags: <defaults>
</compile_context>

<pallas_src>
import jax
import jax.numpy as jnp
from jax.experimental import pallas as pl
from jax.experimental.pallas import tpu as pltpu


def _round_up(x, m):
    return ((x + m - 1) // m) * m


def _label_ffn_kernel(x_ref, w1_ref, b1_ref, w2_ref, b2_ref, out_ref):
    # x:  [TILE_S, D]  (compute dtype)     w1: [D, H]  (compute dtype)   b1: [1, H] f32
    # w2: [H, L_pad]   (compute dtype)     b2: [1, L_pad] f32            out: [TILE_S, L_pad] f32
    x = x_ref[...]
    # First matmul on the MXU, f32 accumulation; bias add + ReLU in f32 on the VPU.
    h = jnp.dot(x, w1_ref[...], preferred_element_type=jnp.float32) + b1_ref[...]
    h = jnp.maximum(h, 0.0)  # TODO(synk): swap if the reference Feedforward uses LeakyReLU.
    # Cast back to the compute dtype (no-op for f32) for the second MXU pass.
    h = h.astype(w2_ref.dtype)
    y = jnp.dot(h, w2_ref[...], preferred_element_type=jnp.float32) + b2_ref[...]
    out_ref[...] = y.astype(out_ref.dtype)


def global_chart_span_parser_forward(span, w1, b1, w2, b2,
                                     *, compute_dtype=jnp.bfloat16, tile_s=256):
    """label_score = Linear2(ReLU(Linear1(span))) in one tiled Pallas kernel.

    span: [num_spans, lstm_dim] f32
    w1:   [lstm_dim, label_hidden_dim]     b1: [label_hidden_dim]
    w2:   [label_hidden_dim, num_labels]   b2: [num_labels]
    compute_dtype: dtype of the matmul operands (bf16 recommended on v6e/v7x; use
                   jnp.float32 for bit-exact f32 results).  Accumulation is always f32.
    tile_s: rows of spans per grid step (multiple of 8; ~256 for v5e/v6e, ~128 for v7x
            when charts are huge -- 64 MiB VMEM per TensorCore there).
    returns: [num_spans, num_labels] f32
    """
    num_spans, lstm_dim = span.shape
    hidden = w1.shape[1]
    num_labels = w2.shape[1]

    # ---- layout / padding (wrapper-side, plain JAX) -------------------------------
    # Lane-dense output: pad the label axis up to a multiple of 128.
    l_pad = _round_up(num_labels, 128)
    # Span tile: multiple of 8 sublanes, no larger than the (padded) span count.
    tile_s = _round_up(min(tile_s, _round_up(num_spans, 8)), 8)
    s_pad = _round_up(num_spans, tile_s)

    x = span.astype(compute_dtype)
    if s_pad != num_spans:
        x = jnp.pad(x, ((0, s_pad - num_spans), (0, 0)))

    w1_c = w1.astype(compute_dtype)
    w2_c = jnp.pad(w2, ((0, 0), (0, l_pad - num_labels))).astype(compute_dtype)
    b1_2d = b1.reshape(1, hidden).astype(jnp.float32)
    b2_2d = jnp.pad(b2, (0, l_pad - num_labels)).reshape(1, l_pad).astype(jnp.float32)

    grid = (pl.cdiv(s_pad, tile_s),)

    out = pl.pallas_call(
        _label_ffn_kernel,
        out_shape=jax.ShapeDtypeStruct((s_pad, l_pad), jnp.float32),
        grid=grid,
        in_specs=[
            # span tiles stream through (double-buffered by the Pallas pipeline).
            pl.BlockSpec((tile_s, lstm_dim), lambda i: (i, 0)),
            # weights / biases: constant block index -> VMEM-resident across steps.
            pl.BlockSpec((lstm_dim, hidden), lambda i: (0, 0)),
            pl.BlockSpec((1, hidden), lambda i: (0, 0)),
            pl.BlockSpec((hidden, l_pad), lambda i: (0, 0)),
            pl.BlockSpec((1, l_pad), lambda i: (0, 0)),
        ],
        out_specs=pl.BlockSpec((tile_s, l_pad), lambda i: (i, 0)),
        compiler_params=pltpu.CompilerParams(
            # spans axis is independent -> megacore-shardable on v7x.
            dimension_semantics=("parallel",),
            # Explicit VMEM budget; tiny footprint here, safely under v7x's 64 MiB.
            vmem_limit_bytes=32 * 1024 * 1024,
        ),
    )(x, w1_c, b1_2d, w2_c, b2_2d)

    # Slice off the label-lane padding and the span-row padding.
    return out[:num_spans, :num_labels]


def _ref_forward(span, w1, b1, w2, b2):
    h = jnp.maximum(span @ w1 + b1, 0.0)
    return h @ w2 + b2


if __name__ == "__main__":
    # Small deterministic setup consistent with the module:
    #   sentence length 8 -> span_num = 8*9//2 = 36 spans
    #   lstm_dim = 32, label_hidden_dim = 32, vocab.num_parse_label = 16
    sen_len = 8
    num_spans = (1 + sen_len) * sen_len // 2  # 36
    lstm_dim = 32
    label_hidden_dim = 32
    num_parse_label = 16

    key = jax.random.PRNGKey(0)
    k_span, k_w1, k_b1, k_w2, k_b2 = jax.random.split(key, 5)

    span = jax.random.normal(k_span, (num_spans, lstm_dim), dtype=jnp.float32)
    w1 = 0.1 * jax.random.normal(k_w1, (lstm_dim, label_hidden_dim), dtype=jnp.float32)
    b1 = 0.1 * jax.random.normal(k_b1, (label_hidden_dim,), dtype=jnp.float32)
    w2 = 0.1 * jax.random.normal(k_w2, (label_hidden_dim, num_parse_label), dtype=jnp.float32)
    b2 = 0.1 * jax.random.normal(k_b2, (num_parse_label,), dtype=jnp.float32)

    ref = _ref_forward(span, w1, b1, w2, b2)

    # 1) f32 compute path: bit-faithful check against the plain-JAX reference.
    out_f32 = global_chart_span_parser_forward(
        span, w1, b1, w2, b2, compute_dtype=jnp.float32)
    out_f32 = jax.block_until_ready(out_f32)
    assert out_f32.shape == (num_spans, num_parse_label)
    assert jnp.allclose(out_f32, ref, atol=1e-4, rtol=1e-4), "f32 mismatch vs reference"

    # 2) bf16 matmul operands (MXU-native on v6e/v7x), f32 accumulation: loose tolerance.
    out_bf16 = global_chart_span_parser_forward(
        span, w1, b1, w2, b2, compute_dtype=jnp.bfloat16)
    out_bf16 = jax.block_until_ready(out_bf16)
    assert out_bf16.shape == (num_spans, num_parse_label)
    assert jnp.allclose(out_bf16, ref, atol=3e-2, rtol=3e-2), "bf16 mismatch vs reference"

    print("KERNEL_OK")
</pallas_src>

<mosaic_0001>
module attributes {stable_mosaic.version = 11 : i64} {
  func.func @_label_ffn_kernel(%arg0: i32, %arg1: memref<40x32xf32, #tpu.memory_space<vmem>>, %arg2: memref<32x32xf32, #tpu.memory_space<vmem>>, %arg3: memref<1x32xf32, #tpu.memory_space<vmem>>, %arg4: memref<32x128xf32, #tpu.memory_space<vmem>>, %arg5: memref<1x128xf32, #tpu.memory_space<vmem>>, %arg6: memref<40x128xf32, #tpu.memory_space<vmem>>) attributes {dimension_semantics = [#tpu.dimension_semantics<parallel>], iteration_bounds = array<i64: 1>, scalar_prefetch = 0 : i64, scratch_operands = 0 : i64, tpu.core_type = #tpu.core_type<tc>, window_params = [{transform_indices = @transform_0, window_bounds = array<i64: 40, 32>}, {pipeline_mode = #tpu.pipeline_mode<synchronous>, transform_indices = @transform_1, window_bounds = array<i64: 32, 32>}, {pipeline_mode = #tpu.pipeline_mode<synchronous>, transform_indices = @transform_2, window_bounds = array<i64: 1, 32>}, {pipeline_mode = #tpu.pipeline_mode<synchronous>, transform_indices = @transform_3, window_bounds = array<i64: 32, 128>}, {pipeline_mode = #tpu.pipeline_mode<synchronous>, transform_indices = @transform_4, window_bounds = array<i64: 1, 128>}, {transform_indices = @transform_5, window_bounds = array<i64: 40, 128>}]} {
    %c0 = arith.constant 0 : index
    %c0_0 = arith.constant 0 : index
    %0 = vector.load %arg1[%c0, %c0_0] : memref<40x32xf32, #tpu.memory_space<vmem>>, vector<40x32xf32>
    %c0_1 = arith.constant 0 : index
    %c0_2 = arith.constant 0 : index
    %1 = vector.load %arg2[%c0_1, %c0_2] : memref<32x32xf32, #tpu.memory_space<vmem>>, vector<32x32xf32>
    %cst = arith.constant dense<0.000000e+00> : vector<40x32xf32>
    %2 = tpu.matmul %0, %1, %cst {dimension_numbers = #tpu.dot_dimension_numbers<[1], [0], [0], [1], [0, 0, 1, 1], [], []>} : vector<40x32xf32>, vector<32x32xf32>, vector<40x32xf32> -> vector<40x32xf32>
    %c0_3 = arith.constant 0 : index
    %c0_4 = arith.constant 0 : index
    %3 = vector.load %arg3[%c0_3, %c0_4] : memref<1x32xf32, #tpu.memory_space<vmem>>, vector<1x32xf32>
    %4 = vector.broadcast %3 : vector<1x32xf32> to vector<40x32xf32>
    %5 = arith.addf %2, %4 : vector<40x32xf32>
    %cst_5 = arith.constant 0.000000e+00 : f32
    %6 = vector.broadcast %cst_5 : f32 to vector<40x32xf32>
    %7 = arith.maximumf %5, %6 : vector<40x32xf32>
    %c0_6 = arith.constant 0 : index
    %c0_7 = arith.constant 0 : index
    %8 = vector.load %arg4[%c0_6, %c0_7] : memref<32x128xf32, #tpu.memory_space<vmem>>, vector<32x128xf32>
    %cst_8 = arith.constant dense<0.000000e+00> : vector<40x128xf32>
    %9 = tpu.matmul %7, %8, %cst_8 {dimension_numbers = #tpu.dot_dimension_numbers<[1], [0], [0], [1], [0, 0, 1, 1], [], []>} : vector<40x32xf32>, vector<32x128xf32>, vector<40x128xf32> -> vector<40x128xf32>
    %c0_9 = arith.constant 0 : index
    %c0_10 = arith.constant 0 : index
    %10 = vector.load %arg5[%c0_9, %c0_10] : memref<1x128xf32, #tpu.memory_space<vmem>>, vector<1x128xf32>
    %11 = vector.broadcast %10 : vector<1x128xf32> to vector<40x128xf32>
    %12 = arith.addf %9, %11 : vector<40x128xf32>
    %c0_11 = arith.constant 0 : index
    %c0_12 = arith.constant 0 : index
    %13 = vector.load %arg6[%c0_11, %c0_12] : memref<40x128xf32, #tpu.memory_space<vmem>>, vector<40x128xf32>
    tpu.vector_store %arg6[%c0_11, %c0_12], %12 {strides = array<i32>} : memref<40x128xf32, #tpu.memory_space<vmem>>, vector<40x128xf32>,
    return
  }
  func.func @transform_0(%arg0: i32) -> (i32, i32) {
    %c0_i32 = arith.constant 0 : i32
    %c0_i32_0 = arith.constant 0 : i32
    return %arg0, %c0_i32 : i32, i32
  }
  func.func @transform_1(%arg0: i32) -> (i32, i32) {
    %c0_i32 = arith.constant 0 : i32
    %c0_i32_0 = arith.constant 0 : i32
    %c0_i32_1 = arith.constant 0 : i32
    return %c0_i32, %c0_i32_0 : i32, i32
  }
  func.func @transform_2(%arg0: i32) -> (i32, i32) {
    %c0_i32 = arith.constant 0 : i32
    %c0_i32_0 = arith.constant 0 : i32
    %c0_i32_1 = arith.constant 0 : i32
    return %c0_i32, %c0_i32_0 : i32, i32
  }
  func.func @transform_3(%arg0: i32) -> (i32, i32) {
    %c0_i32 = arith.constant 0 : i32
    %c0_i32_0 = arith.constant 0 : i32
    %c0_i32_1 = arith.constant 0 : i32
    return %c0_i32, %c0_i32_0 : i32, i32
  }
  func.func @transform_4(%arg0: i32) -> (i32, i32) {
    %c0_i32 = arith.constant 0 : i32
    %c0_i32_0 = arith.constant 0 : i32
    %c0_i32_1 = arith.constant 0 : i32
    return %c0_i32, %c0_i32_0 : i32, i32
  }
  func.func @transform_5(%arg0: i32) -> (i32, i32) {
    %c0_i32 = arith.constant 0 : i32
    %c0_i32_0 = arith.constant 0 : i32
    return %arg0, %c0_i32 : i32, i32
  }
}

</mosaic_0001>

<bundles_post_ra>
// kernel: tpu_custom_call.1
= control target key start
LH: loop header
LB: loop body
LE: loop exit
PB: predicated region body
PF: predicated region fallthrough
CT: control target
= control target key end

     0   :  { %s305_s0 = inlined_call_operand.vmem [shape: f32[40,32], index: 0, kind: input, shape index: {}]   ;;  %s306_s1 = inlined_call_operand.vmem [shape: f32[32,32], index: 1, kind: input, shape index: {}]   ;;  %s307_s2 = inlined_call_operand.vmem [shape: f32[1,32], index: 2, kind: input, shape index: {}]   ;;  %s308_s3 = inlined_call_operand.vmem [shape: f32[32,128], index: 3, kind: input, shape index: {}]   ;;  %s309_s4 = inlined_call_operand.vmem [shape: f32[1,128], index: 4, kind: input, shape index: {}]   ;;  %s310_s5 = inlined_call_operand.hbm [shape: f32[40,128], index: 5, kind: output, shape index: {}]  }
   0x1   :  { %v29_v0 = vld [vmem:[%s306_s1 + $0x18] sm:$0xff]  ;;  %v28_v1 = vld [vmem:[%s306_s1 + $0x10] sm:$0xff]  ;;  %v27_v2 = vld [vmem:[%s306_s1 + $0x8] sm:$0xff] }
   0x2   :  { %175 = vmatpush.msra.mxu2 %v29_v0  ;;  %62 = vmatpush.msra.mxu0 %v29_v0  ;;  %v90_v3 = vld [vmem:[%s308_s3 + $0x18] sm:$0xff]  ;;  %v26_v4 = vld [vmem:[%s306_s1] sm:$0xff] }
   0x3   :  { %122 = vmatpush.msra.mxu1 %v90_v3  ;;  %179 = vmatpush.msra.mxu3 %v90_v3 }
   0x4   :  { %176 = vmatpush.msra.mxu2 %v28_v1  ;;  %63 = vmatpush.msra.mxu0 %v28_v1 }
   0x5   :  { %10 = vsyncpa [#allocation3], 0  ;;  %v24_v5 = vld [vmem:[%s305_s0 + $0x18] sm:$0xff]  ;;  %vm34_vm0 = vcmask 261120   ;;  %v21_v6 = vld [vmem:[%s305_s0] sm:$0xff]  ;;  %s214_s19 = smov [#allocation2]  }
   0x6   :  { %177 = vmatpush.msra.mxu2 %v27_v2  ;;  %64 = vmatpush.msra.mxu0 %v27_v2  ;;  %v25_v7 = vld [vmem:[%s305_s0 + $0x20] sm:$0xff]  ;;  %v22_v8 = vld [vmem:[%s305_s0 + $0x8] sm:$0xff]  ;;  %v23_v9 = vld [vmem:[%s305_s0 + $0x10] sm:$0xff]  ;;  %s151_s20 = sshll.u32 %s214_s19, 4  ;;  %s153_s23 = sshll.u32 %s310_s5, 4  ;;  %s152_s20 = int_to_ptr.vmem [resolvable:$true] %s151_s20  ;;  %s154_s23 = int_to_ptr.hbm [resolvable:$true] %s153_s23 }
   0x7   :  { %v89_v10 = vld [vmem:[%s308_s3 + $0x10] sm:$0xff]  ;;  %v88_v11 = vld [vmem:[%s308_s3 + $0x8] sm:$0xff]  ;;  %v87_v12 = vld [vmem:[%s308_s3] sm:$0xff]  ;;  %s216_s24 = smov 8  }
   0x8   :  { %178 = vmatpush.msra.mxu2 %v26_v4  ;;  %65 = vmatpush.msra.mxu0 %v26_v4  ;;  %v186_v13 = vld [vmem:[%s307_s2] ss:$0 sm:$0xff] }
   0x9   :  { %168 = vmatmul.msk.f32.vlgmr.msra.gmra.mxu2 %vm34_vm0, %v24_v5  ;;  %165 = vmatmul.msk.f32.vlgmr.msra.gmra.mxu0 %vm34_vm0, %v21_v6  ;;  %v187_v29 = vld [vmem:[%s309_s4] ss:$0 sm:$0xff]  ;;  %s215_s4 = smov 128  }
   0xa   :  { %123 = vmatpush.msra.mxu1 %v89_v10  ;;  %180 = vmatpush.msra.mxu3 %v89_v10 }
   0xc   :  { %124 = vmatpush.msra.mxu1 %v88_v11  ;;  %181 = vmatpush.msra.mxu3 %v88_v11 }
   0xe   :  { %125 = vmatpush.msra.mxu1 %v87_v12  ;;  %182 = vmatpush.msra.mxu3 %v87_v12 }
  0x11   :  { %169 = vmatmul.msk.f32.gmra.mxu2 %vm34_vm0, %v25_v7  ;;  %166 = vmatmul.msk.f32.gmra.mxu0 %vm34_vm0, %v22_v8 }
  0x19   :  { %167 = vmatmul.msk.f32.gmra.mxu0 %vm34_vm0, %v23_v9 }
  0x86   :  { %v67_v14 = vpop.f32.mrf.mxu0 }
  0x87   :  { %v68_v15 = vadd.f32 %v186_v13, %v67_v14 }
  0x89   :  { %v82_v16 = vmax.f32 %v68_v15, 0.0 }
  0x8b   :  { %170 = vmatmul.msk.f32.vlgmr.msra.gmra.mxu1 %vm34_vm0, %v82_v16 }
  0x8c   :  { %v76_v17 = vpop.f32.mrf.mxu2 }
  0x8d   :  { %v77_v18 = vadd.f32 %v186_v13, %v76_v17 }
  0x8e   :  { %v70_v19 = vpop.f32.mrf.mxu0 }
  0x8f   :  { %v85_v20 = vmax.f32 %v77_v18, 0.0  ;;  %v71_v21 = vadd.f32 %v186_v13, %v70_v19 }
  0x91   :  { %173 = vmatmul.msk.f32.vlgmr.msra.gmra.mxu3 %vm34_vm0, %v85_v20  ;;  %v83_v22 = vmax.f32 %v71_v21, 0.0 }
  0x93   :  { %171 = vmatmul.msk.f32.gmra.mxu1 %vm34_vm0, %v83_v22 }
  0x94   :  { %v79_v23 = vpop.f32.mrf.mxu2 }
  0x95   :  { %v80_v24 = vadd.f32 %v186_v13, %v79_v23 }
  0x96   :  { %v73_v25 = vpop.f32.mrf.mxu0 }
  0x97   :  { %v86_v26 = vmax.f32 %v80_v24, 0.0  ;;  %v74_v27 = vadd.f32 %v186_v13, %v73_v25 }
  0x99   :  { %174 = vmatmul.msk.f32.gmra.mxu3 %vm34_vm0, %v86_v26  ;;  %v84_v28 = vmax.f32 %v74_v27, 0.0 }
  0x9b   :  { %172 = vmatmul.msk.f32.gmra.mxu1 %vm34_vm0, %v84_v28 }
 0x108   :  { %v127_v30 = vpop.f32.mrf.mxu1 }
 0x109   :  { %v128_v31 = vadd.f32 %v187_v29, %v127_v30 }
 0x10b   :  { %142 = vst [vmem:[#allocation2] sm:$0xff] %v128_v31 }
 0x110   :  { %v130_v32 = vpop.f32.mrf.mxu1 }
 0x111   :  { %v131_v33 = vadd.f32 %v187_v29, %v130_v32 }
 0x113   :  { %143 = vst [vmem:[#allocation2 + $0x8] sm:$0xff] %v131_v33 }
 0x114   :  { %v136_v34 = vpop.f32.mrf.mxu3 }
 0x115   :  { %v137_v35 = vadd.f32 %v187_v29, %v136_v34 }
 0x117   :  { %145 = vst [vmem:[#allocation2 + $0x18] sm:$0xff] %v137_v35 }
 0x118   :  { %v133_v36 = vpop.f32.mrf.mxu1 }
 0x119   :  { %v134_v37 = vadd.f32 %v187_v29, %v133_v36 }
 0x11b   :  { %144 = vst [vmem:[#allocation2 + $0x10] sm:$0xff] %v134_v37 }
 0x11c   :  { %v139_v38 = vpop.f32.mrf.mxu3 }
 0x11d   :  { %v140_v39 = vadd.f32 %v187_v29, %v139_v38 }
 0x11f   :  { %146 = vst [vmem:[#allocation2 + $0x20] sm:$0xff] %v140_v39 }
 0x120   :  { %159 = dma.vmem_to_hbm [thread:$0]  %s152_s20, 640, %s154_s23, [#allocation3], %s215_s4, %s215_s4, %s216_s24  }
 0x121   :  { %212 = dma.done.wait [#allocation3], 640  }
 0x122   :  { %213 = vsyncadd [#allocation3], 4294966656 }
 0x123   :  { %164 = vsyncpa [#allocation3], 1 }

</bundles_post_ra>
